<compile_context>
chip_gen: v6e
topology: v6e:2x2x1
jax: 0.10.0
libtpu: 0.0.40
codegen_flags: <defaults>
</compile_context>

<pallas_src>
import math

import jax
import jax.numpy as jnp
from jax.experimental import pallas as pl
from jax.experimental.pallas import tpu as pltpu


def _round_up(x, m):
    return ((x + m - 1) // m) * m


# ---------------------------------------------------------------------------
# elementwise helpers (used inside kernels)
# ---------------------------------------------------------------------------
def _erf(x):
    # Abramowitz & Stegun 7.1.26 (|err| < 1.5e-7), built from Mosaic-supported
    # ops, so GELU matches PyTorch's exact (erf-based) nn.GELU to f32 tolerance.
    a1, a2, a3, a4, a5 = 0.254829592, -0.284496736, 1.421413741, -1.453152027, 1.061405429
    p = 0.3275911
    s = jnp.where(x >= 0.0, 1.0, -1.0)
    ax = jnp.abs(x)
    t = 1.0 / (1.0 + p * ax)
    poly = ((((a5 * t + a4) * t + a3) * t + a2) * t + a1) * t
    return s * (1.0 - poly * jnp.exp(-ax * ax))


def _gelu(x):
    return 0.5 * x * (1.0 + _erf(x * (1.0 / math.sqrt(2.0))))


# ---------------------------------------------------------------------------
# Pallas kernel 1: lane-dense transposed matmul + bias   (all convs use this)
#   O^T (N, TM) = W (N, K) @ A^T (K, TM) + b,   TM (spatial) in lanes.
# ---------------------------------------------------------------------------
def _matmul_bias_kernel(w_ref, a_ref, b_ref, o_ref):
    acc = jnp.dot(w_ref[...], a_ref[...], preferred_element_type=jnp.float32)
    o_ref[...] = acc + b_ref[...]


def matmul_t_bias(w, at, bias):
    """w: (N, K), at: (K, M) [bf16], bias: (N,)  ->  (N, M) f32."""
    N, K = w.shape
    M = at.shape[1]
    TM = min(512, _round_up(M, 128))      # big lane-dense tiles; K, N are tiny
    Mp = _round_up(M, TM)
    if Mp != M:                           # no-op when M is already tile-aligned
        at = jnp.pad(at, ((0, 0), (0, Mp - M)))
    out = pl.pallas_call(
        _matmul_bias_kernel,
        out_shape=jax.ShapeDtypeStruct((N, Mp), jnp.float32),
        grid=(Mp // TM,),
        in_specs=[
            pl.BlockSpec((N, K), lambda i: (0, 0)),
            pl.BlockSpec((K, TM), lambda i: (0, i)),
            pl.BlockSpec((N, 1), lambda i: (0, 0)),
        ],
        out_specs=pl.BlockSpec((N, TM), lambda i: (0, i)),
        compiler_params=pltpu.CompilerParams(dimension_semantics=("parallel",)),
    )(w.astype(jnp.bfloat16), at.astype(jnp.bfloat16),
      bias.reshape(N, 1).astype(jnp.float32))
    return out if Mp == M else out[:, :M]


# ---------------------------------------------------------------------------
# Pallas kernel 2: fused InstanceNorm3d (affine=False, eps=1e-5)
#                  + optional GELU + optional (normalized) residual + GELU
#   Layout: rows = C*B (sublanes), lanes = S = H*W*D  (lane-dense).
# ---------------------------------------------------------------------------
def _make_in_kernel(has_res, norm_res, act_pre, act_post, inv_s):
    def _norm(v):
        mean = jnp.sum(v, axis=-1, keepdims=True) * inv_s
        vc = v - mean
        var = jnp.sum(vc * vc, axis=-1, keepdims=True) * inv_s
        return vc * jax.lax.rsqrt(var + 1e-5)

    def kernel(x_ref, *rest):
        o_ref = rest[-1]
        y = _norm(x_ref[...])
        if act_pre:
            y = _gelu(y)
        if has_res:
            r = rest[0][...]
            if norm_res:
                r = _norm(r)
            y = y + r
        if act_post:
            y = _gelu(y)
        o_ref[...] = y

    return kernel


def instance_norm_fused(x, residual=None, *, norm_residual=False,
                        act_pre=False, act_post=False):
    C, B, H, W, D = x.shape
    S = H * W * D
    R = C * B
    Rp = _round_up(R, 8)

    def prep(a):
        a2 = a.reshape(R, S).astype(jnp.float32)
        return a2 if Rp == R else jnp.pad(a2, ((0, Rp - R), (0, 0)))

    ins = [prep(x)]
    in_specs = [pl.BlockSpec((8, S), lambda i: (i, 0))]
    if residual is not None:
        ins.append(prep(residual))
        in_specs.append(pl.BlockSpec((8, S), lambda i: (i, 0)))

    kernel = _make_in_kernel(residual is not None, norm_residual,
                             act_pre, act_post, 1.0 / S)
    out = pl.pallas_call(
        kernel,
        out_shape=jax.ShapeDtypeStruct((Rp, S), jnp.float32),
        grid=(Rp // 8,),
        in_specs=in_specs,
        out_specs=pl.BlockSpec((8, S), lambda i: (i, 0)),
        compiler_params=pltpu.CompilerParams(dimension_semantics=("parallel",)),
    )(*ins)
    if Rp != R:
        out = out[:R]
    return out.reshape(C, B, H, W, D)


# ---------------------------------------------------------------------------
# Pallas kernel 3: global average pool (lane reduction, row-block grid)
# ---------------------------------------------------------------------------
def global_avg_pool(x):
    C, B, H, W, D = x.shape
    S = H * W * D
    R = C * B
    Rp = _round_up(R, 8)
    xr = x.reshape(R, S)
    if Rp != R:
        xr = jnp.pad(xr, ((0, Rp - R), (0, 0)))
    inv_s = 1.0 / S

    def kernel(x_ref, o_ref):
        o_ref[...] = jnp.sum(x_ref[...], axis=-1, keepdims=True) * inv_s

    out = pl.pallas_call(
        kernel,
        out_shape=jax.ShapeDtypeStruct((Rp, 1), jnp.float32),
        grid=(Rp // 8,),
        in_specs=[pl.BlockSpec((8, S), lambda i: (i, 0))],
        out_specs=pl.BlockSpec((8, 1), lambda i: (i, 0)),
        compiler_params=pltpu.CompilerParams(dimension_semantics=("parallel",)),
    )(xr)
    pooled = out[:R, 0].reshape(C, B)          # (C, B)
    return jnp.transpose(pooled, (1, 0))        # (B, C)  (tiny)


# ---------------------------------------------------------------------------
# Pallas kernel 4: classifier MLP  Linear(C,64) -> ReLU -> Linear(64,1) on MXU
# ---------------------------------------------------------------------------
def classifier_head(pooled, w1, b1, w2, b2):
    B = pooled.shape[0]

    def kernel(x_ref, w1_ref, b1_ref, w2_ref, b2_ref, o_ref):
        h = jnp.dot(x_ref[...], w1_ref[...],
                    preferred_element_type=jnp.float32) + b1_ref[...]
        h = jnp.maximum(h, 0.0)
        o_ref[...] = jnp.dot(h, w2_ref[...],
                             preferred_element_type=jnp.float32) + b2_ref[...]

    return pl.pallas_call(
        kernel, out_shape=jax.ShapeDtypeStruct((B, 1), jnp.float32)
    )(pooled, w1, b1.reshape(1, -1), w2, b2.reshape(1, -1))


# ---------------------------------------------------------------------------
# Convolutions: im2col (transposed, bf16) in JAX, matmul in Pallas.
# Activation layout: (C, B, H, W, D).
# ---------------------------------------------------------------------------
def pack_conv_weight(w):
    """(kh,kw,kd,Cin,Cout) -> (Cout, T*Cin), T in (ih,iw,id) order."""
    kh, kw, kd, Cin, Cout = w.shape
    return jnp.transpose(w.reshape(kh * kw * kd, Cin, Cout),
                         (2, 0, 1)).reshape(Cout, kh * kw * kd * Cin)


def conv3d_same(x, w_packed, b, k=(3, 3, 3)):
    """stride-1 'same' Conv3d.  x: (Cin, B, H, W, D) -> (Cout, B, H, W, D)."""
    kh, kw, kd = k
    ph, pw, pd = (kh - 1) // 2, (kw - 1) // 2, (kd - 1) // 2
    Cin, B, H, W, D = x.shape
    xp = jnp.pad(x.astype(jnp.bfloat16),
                 ((0, 0), (0, 0), (ph, ph), (pw, pw), (pd, pd)))
    slabs = []
    for ih in range(kh):
        for iw in range(kw):
            for idd in range(kd):
                slabs.append(xp[:, :, ih:ih + H, iw:iw + W, idd:idd + D])
    at = jnp.stack(slabs, axis=0).reshape(kh * kw * kd * Cin, B * H * W * D)
    y = matmul_t_bias(w_packed, at, b)              # (Cout, M)
    return y.reshape(-1, B, H, W, D)


def pack_transposed_weight(wt):
    """ConvTranspose3d(k=3, s=(2,2,1), p=1, op=(1,1,0)) polyphase packing.

    wt: (3,3,3,Cin,Cout) stored in the pre-flipped (dilate+valid-conv)
    convention used by this script's synthetic init.
    Returns (4*Cout, 12*Cin); output rows ordered (ph, pw, cout).
    """
    # TODO(synk): when loading real PyTorch ConvTranspose3d checkpoints, flip
    # the 3x3x3 taps and swap Cin/Cout before calling this packer.
    Cin, Cout = wt.shape[3], wt.shape[4]
    W4 = jnp.zeros((2, 2, Cout, 2, 2, 3, Cin), jnp.float32)
    jmap = {(0, 0): 1, (1, 0): 0, (1, 1): 2}   # (parity, input-offset) -> tap
    for ph in (0, 1):
        for pw in (0, 1):
            for uh in (0, 1):
                for uw in (0, 1):
                    jh = jmap.get((ph, uh))
                    jw = jmap.get((pw, uw))
                    if jh is None or jw is None:
                        continue
                    blk = jnp.transpose(wt[jh, jw], (2, 0, 1))   # (Cout, 3, Cin)
                    W4 = W4.at[ph, pw, :, uh, uw, :, :].set(blk)
    return W4.reshape(4 * Cout, 12 * Cin)


def convtranspose3d_up(x, w4_packed, b4):
    """ConvTranspose3d k=3, stride (2,2,1), pad 1, out_pad (1,1,0) (polyphase)."""
    Cin, B, H, W, D = x.shape
    xp = jnp.pad(x.astype(jnp.bfloat16),
                 ((0, 0), (0, 0), (0, 1), (0, 1), (1, 1)))
    slabs = []
    for uh in range(2):
        for uw in range(2):
            for ud in range(3):
                slabs.append(xp[:, :, uh:uh + H, uw:uw + W, ud:ud + D])
    at = jnp.stack(slabs, axis=0).reshape(12 * Cin, B * H * W * D)
    y = matmul_t_bias(w4_packed, at, b4)            # (4*Cout, M)
    Cout = y.shape[0] // 4
    y = y.reshape(2, 2, Cout, B, H, W, D)           # (ph, pw, Cout, B, H, W, D)
    y = jnp.transpose(y, (2, 3, 4, 0, 5, 1, 6))     # (Cout, B, H, ph, W, pw, D)
    return y.reshape(Cout, B, 2 * H, 2 * W, D)


# ---------------------------------------------------------------------------
# Module blocks
# ---------------------------------------------------------------------------
def conv3d_up_apply(x, p):
    # Convolution(is_transposed, ADN='NDA': InstanceNorm -> GELU)
    y = convtranspose3d_up(x, p["w4"], p["b4"])
    y = instance_norm_fused(y, act_pre=True)                     # GELU(IN(.))
    # ResidualUnit(subunits=1): GELU(IN(Conv(y))) + y   (fused: IN+GELU+add)
    cx = conv3d_same(y, p["wr"], p["br"])
    return instance_norm_fused(cx, residual=y, act_pre=True)


def unet_res_block_apply(x, p):
    h = conv3d_same(x, p["w1"], p["b1"])
    h = instance_norm_fused(h, act_pre=True)                     # GELU(IN(conv1))
    h = conv3d_same(h, p["w2"], p["b2"])
    res = conv3d_same(x, p["w3"], p["b3"], k=(1, 1, 1))          # 1x1x1 residual
    # GELU(IN(h) + IN(res)) fused in one pass
    return instance_norm_fused(h, residual=res, norm_residual=True, act_post=True)


def sam_decoder_forward(params, x_lis, batch, depth):
    def to_layout(x):  # (b*d, c, h, w) -> (c, b, h, w, d)
        bd, c, h, w_ = x.shape
        x5 = x.reshape(batch, depth, c, h, w_)
        return jnp.transpose(x5, (2, 0, 3, 4, 1)).astype(jnp.float32)

    x4 = conv3d_up_apply(to_layout(x_lis[-1]), params["up4"])
    x3 = conv3d_up_apply(to_layout(x_lis[-2]), params["up3"])
    x2 = conv3d_up_apply(to_layout(x_lis[-3]), params["up2"])
    x1 = conv3d_up_apply(to_layout(x_lis[-4]), params["up1"])
    x = jnp.concatenate([x1, x2, x3, x4], axis=0)    # channel concat (axis 0)

    x = unet_res_block_apply(x, params["block"])
    x = conv3d_up_apply(x, params["up_a"])           # num_upsample = log2(8)-1 = 2
    x = conv3d_up_apply(x, params["up_b"])

    pooled = global_avg_pool(x)                      # (B, C)
    c = params["cls"]
    return classifier_head(pooled, c["w1"], c["b1"], c["w2"], c["b2"])


# ---------------------------------------------------------------------------
# deterministic parameter init (synthetic, no checkpoint) + weight packing
# ---------------------------------------------------------------------------
def init_params(key, in_dim, out_dim):
    keys = iter(jax.random.split(key, 64))

    def w(shape, fan_in):
        return jax.random.normal(next(keys), shape, jnp.float32) / math.sqrt(fan_in)

    def conv_up_params(cin, cout):
        wt = w((3, 3, 3, cin, cout), 27 * cin)
        bt = jnp.zeros((cout,), jnp.float32)
        wr = w((3, 3, 3, cout, cout), 27 * cout)
        br = jnp.zeros((cout,), jnp.float32)
        return dict(w4=pack_transposed_weight(wt), b4=jnp.tile(bt, 4),
                    wr=pack_conv_weight(wr), br=br)

    return dict(
        up4=conv_up_params(in_dim, out_dim),
        up3=conv_up_params(in_dim, out_dim),
        up2=conv_up_params(in_dim, out_dim),
        up1=conv_up_params(in_dim, out_dim),
        block=dict(  # UnetResBlock convs are bias-free in MONAI -> zero bias
            w1=pack_conv_weight(w((3, 3, 3, 4 * out_dim, out_dim), 27 * 4 * out_dim)),
            b1=jnp.zeros((out_dim,), jnp.float32),
            w2=pack_conv_weight(w((3, 3, 3, out_dim, out_dim), 27 * out_dim)),
            b2=jnp.zeros((out_dim,), jnp.float32),
            w3=pack_conv_weight(w((1, 1, 1, 4 * out_dim, out_dim), 4 * out_dim)),
            b3=jnp.zeros((out_dim,), jnp.float32),
        ),
        up_a=conv_up_params(out_dim, out_dim),
        up_b=conv_up_params(out_dim, out_dim),
        cls=dict(
            w1=w((out_dim, 64), out_dim), b1=jnp.zeros((64,), jnp.float32),
            w2=w((64, 1), 64), b2=jnp.zeros((1,), jnp.float32),
        ),
    )


if __name__ == "__main__":
    key = jax.random.PRNGKey(0)
    batch, depth = 2, 4
    in_dim, out_dim = 8, 4
    h = w = 4

    pkey, xkey = jax.random.split(key)
    params = init_params(pkey, in_dim, out_dim)
    xkeys = jax.random.split(xkey, 4)
    # same shapes as the SAM encoder feature list: (batch*depth, in_dim, h, w)
    x_lis = [jax.random.normal(k, (batch * depth, in_dim, h, w), jnp.float32)
             for k in xkeys]

    out = sam_decoder_forward(params, x_lis, batch, depth)
    out = jax.block_until_ready(out)
    assert out.shape == (batch, 1), out.shape
    print("KERNEL_OK")
</pallas_src>

<mosaic_0001>
module attributes {stable_mosaic.version = 11 : i64} {
  func.func @_matmul_bias_kernel(%arg0: i32, %arg1: memref<16x96xbf16, #tpu.memory_space<vmem>>, %arg2: memref<96x128xbf16, #tpu.memory_space<vmem>>, %arg3: memref<16x1xf32, #tpu.memory_space<vmem>>, %arg4: memref<16x128xf32, #tpu.memory_space<vmem>>) attributes {dimension_semantics = [#tpu.dimension_semantics<parallel>], iteration_bounds = array<i64: 1>, scalar_prefetch = 0 : i64, scratch_operands = 0 : i64, tpu.core_type = #tpu.core_type<tc>, window_params = [{pipeline_mode = #tpu.pipeline_mode<synchronous>, transform_indices = @transform_0, window_bounds = array<i64: 16, 96>}, {transform_indices = @transform_1, window_bounds = array<i64: 96, 128>}, {pipeline_mode = #tpu.pipeline_mode<synchronous>, transform_indices = @transform_2, window_bounds = array<i64: 16, 1>}, {transform_indices = @transform_3, window_bounds = array<i64: 16, 128>}]} {
    %c0 = arith.constant 0 : index
    %c0_0 = arith.constant 0 : index
    %0 = vector.load %arg1[%c0, %c0_0] : memref<16x96xbf16, #tpu.memory_space<vmem>>, vector<16x96xbf16>
    %c0_1 = arith.constant 0 : index
    %c0_2 = arith.constant 0 : index
    %1 = vector.load %arg2[%c0_1, %c0_2] : memref<96x128xbf16, #tpu.memory_space<vmem>>, vector<96x128xbf16>
    %cst = arith.constant dense<0.000000e+00> : vector<16x128xf32>
    %2 = tpu.matmul %0, %1, %cst {dimension_numbers = #tpu.dot_dimension_numbers<[1], [0], [0], [1], [0, 0, 1, 1], [], []>} : vector<16x96xbf16>, vector<96x128xbf16>, vector<16x128xf32> -> vector<16x128xf32>
    %c0_3 = arith.constant 0 : index
    %c0_4 = arith.constant 0 : index
    %3 = vector.load %arg3[%c0_3, %c0_4] : memref<16x1xf32, #tpu.memory_space<vmem>>, vector<16x1xf32>
    %4 = vector.broadcast %3 : vector<16x1xf32> to vector<16x128xf32>
    %5 = arith.addf %2, %4 : vector<16x128xf32>
    %c0_5 = arith.constant 0 : index
    %c0_6 = arith.constant 0 : index
    %6 = vector.load %arg4[%c0_5, %c0_6] : memref<16x128xf32, #tpu.memory_space<vmem>>, vector<16x128xf32>
    tpu.vector_store %arg4[%c0_5, %c0_6], %5 {strides = array<i32>} : memref<16x128xf32, #tpu.memory_space<vmem>>, vector<16x128xf32>,
    return
  }
  func.func @transform_0(%arg0: i32) -> (i32, i32) {
    %c0_i32 = arith.constant 0 : i32
    %c0_i32_0 = arith.constant 0 : i32
    %c0_i32_1 = arith.constant 0 : i32
    return %c0_i32, %c0_i32_0 : i32, i32
  }
  func.func @transform_1(%arg0: i32) -> (i32, i32) {
    %c0_i32 = arith.constant 0 : i32
    %c0_i32_0 = arith.constant 0 : i32
    return %c0_i32, %arg0 : i32, i32
  }
  func.func @transform_2(%arg0: i32) -> (i32, i32) {
    %c0_i32 = arith.constant 0 : i32
    %c0_i32_0 = arith.constant 0 : i32
    %c0_i32_1 = arith.constant 0 : i32
    return %c0_i32, %c0_i32_0 : i32, i32
  }
  func.func @transform_3(%arg0: i32) -> (i32, i32) {
    %c0_i32 = arith.constant 0 : i32
    %c0_i32_0 = arith.constant 0 : i32
    return %c0_i32, %arg0 : i32, i32
  }
}

</mosaic_0001>

<bundles_post_ra>
// kernel: tpu_custom_call.1
= control target key start
LH: loop header
LB: loop body
LE: loop exit
PB: predicated region body
PF: predicated region fallthrough
CT: control target
= control target key end

     0   :  { %8 = vsyncpa [#allocation3], 0  ;;  %s297_s0 = inlined_call_operand.vmem [shape: bf16[16,96], index: 0, kind: input, shape index: {}]   ;;  %s298_s1 = inlined_call_operand.hbm [shape: bf16[96,128], index: 1, kind: input, shape index: {}]   ;;  %s299_s2 = inlined_call_operand.vmem [shape: f32[16,1], index: 2, kind: input, shape index: {}]   ;;  %s300_s3 = inlined_call_operand.hbm [shape: f32[16,128], index: 3, kind: output, shape index: {}]  }
   0x1   :  { %9 = vsyncpa [#allocation4], 0  ;;  %s253_s12 = smov [#allocation2]  }
   0x2   :  { %s17_s13 = sshll.u32 %s253_s12, 4  ;;  %s18_s13 = int_to_ptr.vmem [resolvable:$true] %s17_s13 }
   0x3   :  { %s217_s14 = scalar_lea.vmem %s18_s13, 768  ;;  %p222_p1 = scmp.lt.s32.totalorder %s18_s13, %s18_s13 }
   0x4   :  { %p218_p0 = scmp.ne.s32.totalorder %s18_s13, %s217_s14  ;;  %p223_p2 = scmp.lt.s32.totalorder %s217_s14, %s217_s14 }
   0x6   :  { %p224_p3 = por %p223_p2, %p222_p1 }
   0x8   :  { %p225_p4 = pnand %p224_p3, %p218_p0 }
   0xa   :  { %228 = shalt.err (!%p225_p4)
}
   0xb   :  { %s254_s15 = smov 64   ;;  %s255_s16 = smov 4  }
   0xc   :  { %23 = dma.hbm_to_vmem [thread:$0]  %s298_s1, 768, %s18_s13, [#allocation3], %s254_s15, %s254_s15, %s255_s16  }
   0xd   :  { %249 = dma.done.wait [#allocation3], 768  }
   0xe   :  { %250 = vsyncadd [#allocation3], 4294966528  ;;  %v256_v0 = vmov 0.0   ;;  %vm257_vm0 = vmmov 0   ;;  %v258_v1 = vmov 0   ;;  %v202_v2 = vld [vmem:[#allocation2 + $0x28] sm:$0xff]  }
   0xf   :  { %176 = vmatprep.subr.bf16.mxu0 %v256_v0  ;;  %188 = vmatprep.mubr.msk.bf16.mxu0 %vm257_vm0, %v256_v0  ;;  %v203_v3 = vld [vmem:[#allocation2 + $0x20] sm:$0xff]   ;;  %v204_v4 = vld [vmem:[#allocation2 + $0x18] sm:$0xff]   ;;  %v45_v6 = vld [vmem:[%s299_s2 + $0x8] sm:$0xff]  ;;  %vm97_vm1 = vcmask 785408  }
  0x10   :  { %201 = vset.pattern.permute.xlu0 %v258_v1  ;;  %177 = vmatpush3.bf16.msra.mxu0 %v202_v2  ;;  %v44_v5 = vld [vmem:[%s299_s2] sm:$0xff]  ;;  %v205_v7 = vld [vmem:[#allocation2 + $0x10] sm:$0xff]   ;;  %v206_v8 = vld [vmem:[#allocation2 + $0x8] sm:$0xff]   ;;  %s259_s2 = smov [#allocation5]  }
  0x11   :  { %178 = vmatprep.subr.bf16.mxu0 %v256_v0  ;;  %48 = vperm.xlu0 %201, %v44_v5   ;;  %v207_v9 = vld [vmem:[#allocation2] sm:$0xff]   ;;  %s149_s24 = sshll.u32 %s259_s2, 4  ;;  %s150_s24 = int_to_ptr.vmem [resolvable:$true] %s149_s24 }
  0x12   :  { %v208_v10 = vld [vmem:[%s297_s0] sm:$0xff]   ;;  %s229_s25 = scalar_lea.vmem %s150_s24, 256  ;;  %p234_p6 = scmp.lt.s32.totalorder %s150_s24, %s150_s24 }
  0x13   :  { %p230_p5 = scmp.ne.s32.totalorder %s150_s24, %s229_s25  ;;  %p235_p7 = scmp.lt.s32.totalorder %s229_s25, %s229_s25 }
  0x14   :  { %179 = vmatpush3.bf16.msra.mxu0 %v203_v3 }
  0x15   :  { %180 = vmatprep.subr.bf16.mxu0 %v256_v0  ;;  %53 = vperm.xlu0 %201, %v45_v6   ;;  %p236_p8 = por %p235_p7, %p234_p6 }
  0x17   :  { %p237_p9 = pnand %p236_p8, %p230_p5 }
  0x18   :  { %181 = vmatpush3.bf16.msra.mxu0 %v204_v4 }
  0x19   :  { %182 = vmatprep.subr.bf16.mxu0 %v256_v0 }
  0x1c   :  { %183 = vmatpush3.bf16.msra.mxu0 %v205_v7 }
  0x1d   :  { %184 = vmatprep.subr.bf16.mxu0 %v256_v0 }
  0x20   :  { %185 = vmatpush3.bf16.msra.mxu0 %v206_v8 }
  0x21   :  { %186 = vmatprep.subr.bf16.mxu0 %v256_v0 }
  0x24   :  { %187 = vmatpush3.bf16.msra.mxu0 %v207_v9 }
  0x27   :  { %189 = vmatmul.mubr.msk.bf16.vlgmr.msra.gmra.mxu0 %vm97_vm1, %v208_v10 }
  0x8c   :  { %v49_v11 = vpop.permute.xlu0 %48 }
  0x90   :  { %v54_v15 = vpop.permute.xlu0 %53 }
  0xe7   :  { %v135_v12 = vpop.f32.mrf.mxu0 }
  0xe8   :  { %v136_v13 = vadd.f32 %v135_v12, %v49_v11 }
  0xe9   :  { %v190_v14 = vpop.f32.mrf.mxu0 }
  0xea   :  { %142 = vst [vmem:[#allocation5] sm:$0xff] %v136_v13 }
  0xeb   :  { %v138_v16 = vpop.f32.mrf.mxu0 }
  0xec   :  { %v139_v17 = vadd.f32 %v138_v16, %v54_v15 }
  0xed   :  { %v191_v18 = vpop.f32.mrf.mxu0 }
  0xee   :  { %143 = vst [vmem:[#allocation5 + $0x8] sm:$0xff] %v139_v17 }
  0xef   :  { %240 = shalt.err (!%p237_p9)
}
  0xf0   :  { %s260_s0 = smov 128   ;;  %s261_s26 = smov 8  }
  0xf1   :  { %155 = dma.vmem_to_hbm [thread:$0]  %s150_s24, 256, %s300_s3, [#allocation4], %s260_s0, %s260_s0, %s261_s26  }
  0xf2   :  { %251 = dma.done.wait [#allocation4], 256  }
  0xf3   :  { %252 = vsyncadd [#allocation4], 4294967040 }
  0xf4   :  { %159 = vsyncpa [#allocation3], 1 }
  0xf5   :  { %160 = vsyncpa [#allocation4], 1 }

</bundles_post_ra>
